<compile_context>
chip_gen: v7x
topology: tpu7x:2x2x1
jax: 0.10.0
libtpu: 0.0.40
codegen_flags: <defaults>
</compile_context>

<pallas_src>
import functools

import jax
import jax.numpy as jnp
import numpy as np
from jax.experimental import pallas as pl
from jax.experimental.pallas import tpu as pltpu

LN_EPS = 1e-6


# ----------------------------- helpers ------------------------------------ #

@functools.lru_cache(maxsize=None)
def _vmem_limit_bytes():
    """Per-generation VMEM budget with headroom (v5e/v6e ~100 MiB, v7x ~51 MiB)."""
    try:
        cap = int(pltpu.get_tpu_info().vmem_capacity_bytes)
    except Exception:  # query unavailable -> conservative default safe on all gens
        cap = 64 * 1024 * 1024
    return min(int(cap * 0.8), 100 * 1024 * 1024)


def _layernorm(x, gamma, beta, eps=LN_EPS):
    mu = jnp.mean(x, axis=-1, keepdims=True)
    var = jnp.mean((x - mu) ** 2, axis=-1, keepdims=True)
    return (x - mu) * jax.lax.rsqrt(var + eps) * gamma + beta


def _const_spec(shape):
    # full-extent weight block, constant index_map -> resident across the grid
    n = len(shape)
    return pl.BlockSpec(shape, lambda *_, _n=n: (0,) * _n)


# ----------------------------- kernels ------------------------------------ #

def embed_pos_ln_kernel(emb_ref, pos_ref, gamma_ref, beta_ref, out_ref,
                        *, scale_emb, d_model):
    # TODO(synk): this mem-bound glue kernel could be fused into the first
    # encoder-layer pallas_call to drop one (B*S, d) HBM round trip.
    x = emb_ref[...]                              # (S, D) f32
    if scale_emb:
        x = x * (d_model ** 0.5)
    x = x + pos_ref[...]                          # resident (S, D) pos block
    # TODO(synk): dropout is identity in eval mode; training-mode RNG dropout
    # is not implemented in the kernel.
    out_ref[...] = _layernorm(x, gamma_ref[...], beta_ref[...]).astype(out_ref.dtype)


def _encoder_layer_step(x_ref, wqkv_ref, fc_ref, ln1g_ref, ln1b_ref,
                        w1_ref, b1_ref, w2_ref, b2_ref, ln2g_ref, ln2b_ref,
                        out_ref, attn_ref, o_acc, *, d_k, d_v):
    """Grid step (b, h): one attention head of one sequence; FFN on last head."""
    h = pl.program_id(1)
    last_h = pl.num_programs(1) - 1

    x = x_ref[...]                                 # (S, D) bf16, resident per b

    # Residual preload: o_acc accumulates residual + sum_h ctx_h @ Wo_h.
    @pl.when(h == 0)
    def _():
        o_acc[...] = x.astype(jnp.float32)

    # Per-head fused Q|K|V projection: one bf16 MXU matmul, f32 accumulation.
    # NOTE: 1/sqrt(d_k) is folded into the Q columns of the weight at init.
    qkv = jnp.dot(x, wqkv_ref[0], preferred_element_type=jnp.float32)  # (S, 2dk+dv)
    q = qkv[:, :d_k].astype(jnp.bfloat16)
    k = qkv[:, d_k:2 * d_k].astype(jnp.bfloat16)
    v = qkv[:, 2 * d_k:].astype(jnp.bfloat16)

    s = jax.lax.dot_general(q, k, (((1,), (1,)), ((), ())),
                            preferred_element_type=jnp.float32)        # (S, S) f32
    # TODO(synk): padding mask not applied (mask=None path only).
    s = s - jnp.max(s, axis=-1, keepdims=True)
    p = jnp.exp(s)                                                     # f32 (v5e-safe)
    recip = pl.reciprocal(jnp.sum(p, axis=-1, keepdims=True), approx=True)

    if attn_ref is not None:
        a = p * recip                               # map must be materialized anyway
        attn_ref[0, 0] = a.astype(attn_ref.dtype)   # per-head store: one (S,S) live
        ctx = jnp.dot(a.astype(jnp.bfloat16), v, preferred_element_type=jnp.float32)
    else:
        # Deferred normalization: scale the (S, d_v) context, not the (S, S) map.
        ctx = jnp.dot(p.astype(jnp.bfloat16), v, preferred_element_type=jnp.float32)
        ctx = ctx * recip

    # Output projection for this head, accumulated: concat(heads) @ Wo == sum_h.
    o_acc[...] += jnp.dot(ctx.astype(jnp.bfloat16), fc_ref[0],
                          preferred_element_type=jnp.float32)

    # Last head: post-norm residual, then position-wise FFN, then post-norm.
    @pl.when(h == last_h)
    def _():
        o = _layernorm(o_acc[...], ln1g_ref[...], ln1b_ref[...])
        h1 = jnp.dot(o.astype(jnp.bfloat16), w1_ref[...],
                     preferred_element_type=jnp.float32) + b1_ref[...]
        h1 = jnp.maximum(h1, 0.0)
        f = jnp.dot(h1.astype(jnp.bfloat16), w2_ref[...],
                    preferred_element_type=jnp.float32) + b2_ref[...]
        # TODO(synk): attention/output/FFN dropout are eval-mode identities.
        out_ref[...] = _layernorm(f + o, ln2g_ref[...],
                                  ln2b_ref[...]).astype(out_ref.dtype)


def encoder_layer_kernel_attn(x_ref, wqkv_ref, fc_ref, ln1g_ref, ln1b_ref,
                              w1_ref, b1_ref, w2_ref, b2_ref, ln2g_ref, ln2b_ref,
                              out_ref, attn_ref, o_acc, *, d_k, d_v):
    _encoder_layer_step(x_ref, wqkv_ref, fc_ref, ln1g_ref, ln1b_ref,
                        w1_ref, b1_ref, w2_ref, b2_ref, ln2g_ref, ln2b_ref,
                        out_ref, attn_ref, o_acc, d_k=d_k, d_v=d_v)


def encoder_layer_kernel_noattn(x_ref, wqkv_ref, fc_ref, ln1g_ref, ln1b_ref,
                                w1_ref, b1_ref, w2_ref, b2_ref, ln2g_ref, ln2b_ref,
                                out_ref, o_acc, *, d_k, d_v):
    _encoder_layer_step(x_ref, wqkv_ref, fc_ref, ln1g_ref, ln1b_ref,
                        w1_ref, b1_ref, w2_ref, b2_ref, ln2g_ref, ln2b_ref,
                        out_ref, None, o_acc, d_k=d_k, d_v=d_v)


# ----------------------------- wrappers ------------------------------------ #

def run_embed_pos_ln(emb_flat, pos, gamma, beta, *, B, S, scale_emb, d_model):
    d = emb_flat.shape[1]
    kern = functools.partial(embed_pos_ln_kernel,
                             scale_emb=scale_emb, d_model=d_model)
    return pl.pallas_call(
        kern,
        out_shape=jax.ShapeDtypeStruct((B * S, d), jnp.bfloat16),
        grid_spec=pltpu.PrefetchScalarGridSpec(
            num_scalar_prefetch=0,
            grid=(B,),
            in_specs=[
                pl.BlockSpec((S, d), lambda b: (b, 0)),   # per-batch activation tile
                _const_spec((S, d)),                      # resident positional table
                _const_spec((1, d)),                      # LN gamma
                _const_spec((1, d)),                      # LN beta
            ],
            out_specs=pl.BlockSpec((S, d), lambda b: (b, 0)),
        ),
        compiler_params=pltpu.CompilerParams(
            dimension_semantics=("parallel",),
            vmem_limit_bytes=_vmem_limit_bytes()),
    )(emb_flat, pos, gamma, beta)


def run_encoder_layer(x_flat, lp, *, B, S, n_heads, d_k, d_v, return_attention):
    d = x_flat.shape[1]
    d_inner = lp["w1"].shape[1]
    w_head = lp["wqkv"].shape[-1]            # 2*d_k + d_v

    weight_args = (lp["wqkv"], lp["fc"], lp["ln1_g"], lp["ln1_b"],
                   lp["w1"], lp["b1"], lp["w2"], lp["b2"],
                   lp["ln2_g"], lp["ln2_b"])
    weight_specs = [
        pl.BlockSpec((1, d, w_head), lambda b, h: (h, 0, 0)),   # per-head fused QKV
        pl.BlockSpec((1, d_v, d), lambda b, h: (h, 0, 0)),      # per-head out proj
        _const_spec((1, d)), _const_spec((1, d)),
        _const_spec((d, d_inner)), _const_spec((1, d_inner)),
        _const_spec((d_inner, d)), _const_spec((1, d)),
        _const_spec((1, d)), _const_spec((1, d)),
    ]
    in_specs = [pl.BlockSpec((S, d), lambda b, h: (b, 0))] + weight_specs
    out_x_spec = pl.BlockSpec((S, d), lambda b, h: (b, 0))      # written on last head
    cparams = pltpu.CompilerParams(
        dimension_semantics=("parallel", "arbitrary"),
        vmem_limit_bytes=_vmem_limit_bytes())
    scratch = [pltpu.VMEM((S, d), jnp.float32)]                 # residual + MHA acc

    if return_attention:
        kern = functools.partial(encoder_layer_kernel_attn, d_k=d_k, d_v=d_v)
        out, attn = pl.pallas_call(
            kern,
            out_shape=(jax.ShapeDtypeStruct((B * S, d), jnp.bfloat16),
                       jax.ShapeDtypeStruct((B, n_heads, S, S), jnp.bfloat16)),
            grid_spec=pltpu.PrefetchScalarGridSpec(
                num_scalar_prefetch=0,
                grid=(B, n_heads),
                in_specs=in_specs,
                out_specs=[out_x_spec,
                           pl.BlockSpec((1, 1, S, S), lambda b, h: (b, h, 0, 0))],
                scratch_shapes=scratch),
            compiler_params=cparams,
        )(x_flat, *weight_args)
        return out, attn

    kern = functools.partial(encoder_layer_kernel_noattn, d_k=d_k, d_v=d_v)
    out = pl.pallas_call(
        kern,
        out_shape=jax.ShapeDtypeStruct((B * S, d), jnp.bfloat16),
        grid_spec=pltpu.PrefetchScalarGridSpec(
            num_scalar_prefetch=0,
            grid=(B, n_heads),
            in_specs=in_specs,
            out_specs=out_x_spec,
            scratch_shapes=scratch),
        compiler_params=cparams,
    )(x_flat, *weight_args)
    return out, None


# ----------------------------- model setup --------------------------------- #

def sinusoid_pos_table(n_position, d_model):
    pos = np.arange(n_position)[:, None].astype(np.float64)
    i = np.arange(d_model)[None, :]
    angle = pos / np.power(10000.0, 2.0 * (i // 2) / d_model)
    table = np.zeros((n_position, d_model), dtype=np.float32)
    table[:, 0::2] = np.sin(angle[:, 0::2])
    table[:, 1::2] = np.cos(angle[:, 1::2])
    return jnp.asarray(table)


def init_encoder_params(key, *, n_source_vocab, d_word_vec, n_layers, n_heads,
                        d_k, d_v, d_model, d_inner, pad_idx):
    keys = jax.random.split(key, 1 + 6 * n_layers)
    std = 0.02
    emb = std * jax.random.normal(keys[0], (n_source_vocab, d_word_vec), jnp.float32)
    emb = emb.at[pad_idx].set(0.0)                 # nn.Embedding padding_idx row

    params = {
        "emb": emb,
        "enc_ln_g": jnp.ones((1, d_model), jnp.float32),
        "enc_ln_b": jnp.zeros((1, d_model), jnp.float32),
        "layers": [],
    }
    scale = 1.0 / (d_k ** 0.5)
    for l in range(n_layers):
        k = keys[1 + 6 * l:1 + 6 * (l + 1)]
        wq = std * jax.random.normal(k[0], (d_model, n_heads * d_k), jnp.float32)
        wk = std * jax.random.normal(k[1], (d_model, n_heads * d_k), jnp.float32)
        wv = std * jax.random.normal(k[2], (d_model, n_heads * d_v), jnp.float32)
        fc = std * jax.random.normal(k[3], (n_heads * d_v, d_model), jnp.float32)
        w1 = std * jax.random.normal(k[4], (d_model, d_inner), jnp.float32)
        w2 = std * jax.random.normal(k[5], (d_inner, d_model), jnp.float32)
        # Head-major fused Q|K|V weight (H, d_model, 2*d_k + d_v), 1/sqrt(d_k)
        # folded into the Q columns; bf16 storage (f32 accumulation in-kernel).
        wq_h = jnp.transpose(wq.reshape(d_model, n_heads, d_k), (1, 0, 2)) * scale
        wk_h = jnp.transpose(wk.reshape(d_model, n_heads, d_k), (1, 0, 2))
        wv_h = jnp.transpose(wv.reshape(d_model, n_heads, d_v), (1, 0, 2))
        params["layers"].append({
            "wqkv": jnp.concatenate([wq_h, wk_h, wv_h], axis=-1).astype(jnp.bfloat16),
            "fc": fc.reshape(n_heads, d_v, d_model).astype(jnp.bfloat16),
            "ln1_g": jnp.ones((1, d_model), jnp.float32),
            "ln1_b": jnp.zeros((1, d_model), jnp.float32),
            "w1": w1.astype(jnp.bfloat16),
            "b1": jnp.zeros((1, d_inner), jnp.float32),
            "w2": w2.astype(jnp.bfloat16),
            "b2": jnp.zeros((1, d_model), jnp.float32),
            "ln2_g": jnp.ones((1, d_model), jnp.float32),
            "ln2_b": jnp.zeros((1, d_model), jnp.float32),
        })
    return params


def encoder_forward(token_ids, params, pos_table, *, d_model, n_heads, d_k, d_v,
                    scale_emb=False, mask=None, return_attention=True):
    """Mirrors Encoder.forward(x, mask=None, return_attention=True) in eval mode."""
    assert mask is None  # TODO(synk): padding-mask path not implemented.
    B, S = token_ids.shape
    # bf16 activation tiles want 16-sublane blocks; use S multiples of 128 for
    # fully lane/sublane-dense attention-map stores at realistic sizes.
    assert S % 16 == 0, "sequence length must be a multiple of 16 (bf16 sublane tiling)"

    # glue: embedding gather (no clean Pallas equivalent without a DMA gather)
    emb_flat = jnp.take(params["emb"], token_ids, axis=0).reshape(B * S, d_model)
    pos = pos_table[:S]                            # (S, D) resident block

    x = run_embed_pos_ln(emb_flat, pos,
                         params["enc_ln_g"], params["enc_ln_b"],
                         B=B, S=S, scale_emb=scale_emb, d_model=d_model)

    attentions = []
    for lp in params["layers"]:
        x, attn = run_encoder_layer(x, lp, B=B, S=S, n_heads=n_heads,
                                    d_k=d_k, d_v=d_v,
                                    return_attention=return_attention)
        if return_attention:
            attentions.append(attn)

    return x.astype(jnp.float32).reshape(B, S, d_model), attentions


# ----------------------------- pure-JAX reference --------------------------- #

def _ln_ref(x, g, b, eps=LN_EPS):
    mu = jnp.mean(x, axis=-1, keepdims=True)
    var = jnp.mean((x - mu) ** 2, axis=-1, keepdims=True)
    return (x - mu) * jax.lax.rsqrt(var + eps) * g + b


def encoder_forward_ref(token_ids, params, pos_table, *, d_model, n_heads, d_k,
                        d_v, scale_emb=False):
    """f32 XLA reference using the same (scale-folded, head-major) parameters."""
    B, S = token_ids.shape
    x = jnp.take(params["emb"], token_ids, axis=0)
    if scale_emb:
        x = x * (d_model ** 0.5)
    x = x + pos_table[:S][None]
    x = _ln_ref(x, params["enc_ln_g"].reshape(-1), params["enc_ln_b"].reshape(-1))
    for lp in params["layers"]:
        wqkv = lp["wqkv"].astype(jnp.float32)      # (H, d, 2dk+dv), scale folded
        fc = lp["fc"].astype(jnp.float32)          # (H, dv, d)
        qkv = jnp.einsum('bsd,hdw->bhsw', x, wqkv)
        q, k, v = qkv[..., :d_k], qkv[..., d_k:2 * d_k], qkv[..., 2 * d_k:]
        s = jnp.einsum('bhqc,bhkc->bhqk', q, k)
        a = jax.nn.softmax(s, axis=-1)
        ctx = jnp.einsum('bhqk,bhkc->bhqc', a, v)
        o = x + jnp.einsum('bhqc,hcm->bqm', ctx, fc)
        o = _ln_ref(o, lp["ln1_g"].reshape(-1), lp["ln1_b"].reshape(-1))
        h1 = jnp.maximum(o @ lp["w1"].astype(jnp.float32) + lp["b1"].reshape(-1), 0.0)
        f = h1 @ lp["w2"].astype(jnp.float32) + lp["b2"].reshape(-1)
        x = _ln_ref(f + o, lp["ln2_g"].reshape(-1), lp["ln2_b"].reshape(-1))
    return x


# ----------------------------- demo ---------------------------------------- #

if __name__ == "__main__":
    # small, forward-consistent shapes
    n_source_vocab = 50
    d_word_vec = d_model = 32
    n_layers = 2
    n_heads = 4
    d_k = d_v = 8
    d_inner = 64
    pad_idx = 0
    n_position = 200
    B, S = 2, 16

    key = jax.random.PRNGKey(0)
    k_param, k_tok = jax.random.split(key)

    params = init_encoder_params(
        k_param, n_source_vocab=n_source_vocab, d_word_vec=d_word_vec,
        n_layers=n_layers, n_heads=n_heads, d_k=d_k, d_v=d_v,
        d_model=d_model, d_inner=d_inner, pad_idx=pad_idx)
    pos_table = sinusoid_pos_table(n_position, d_model)

    token_ids = jax.random.randint(k_tok, (B, S), 0, n_source_vocab, dtype=jnp.int32)

    out, attns = encoder_forward(
        token_ids, params, pos_table,
        d_model=d_model, n_heads=n_heads, d_k=d_k, d_v=d_v,
        scale_emb=False, mask=None, return_attention=True)

    out = jax.block_until_ready(out)
    attns = [jax.block_until_ready(a) for a in attns]

    assert out.shape == (B, S, d_model)
    assert len(attns) == n_layers
    assert all(a.shape == (B, n_heads, S, S) for a in attns)
    assert bool(jnp.all(jnp.isfinite(out)))

    # attention rows must (approximately) sum to 1 (bf16 maps + approx reciprocal)
    row_sums = jnp.sum(attns[0].astype(jnp.float32), axis=-1)
    assert bool(jnp.max(jnp.abs(row_sums - 1.0)) < 0.06)

    # loose structural check vs. an f32 XLA reference (bf16 kernel tolerance)
    ref = jax.block_until_ready(encoder_forward_ref(
        token_ids, params, pos_table, d_model=d_model, n_heads=n_heads,
        d_k=d_k, d_v=d_v, scale_emb=False))
    np.testing.assert_allclose(np.asarray(out), np.asarray(ref), atol=0.25, rtol=0.25)

    # also exercise the variant that never materializes the attention maps
    out2, _ = encoder_forward(
        token_ids, params, pos_table,
        d_model=d_model, n_heads=n_heads, d_k=d_k, d_v=d_v,
        scale_emb=False, mask=None, return_attention=False)
    out2 = jax.block_until_ready(out2)
    assert out2.shape == (B, S, d_model)
    assert bool(jnp.all(jnp.isfinite(out2)))
    np.testing.assert_allclose(np.asarray(out2), np.asarray(out), atol=0.05, rtol=0.05)

    print("KERNEL_OK")
</pallas_src>

<mosaic_0001>
module attributes {stable_mosaic.version = 11 : i64} {
  func.func @embed_pos_ln_kernel(%arg0: i32, %arg1: memref<16x32xf32, #tpu.memory_space<vmem>>, %arg2: memref<16x32xf32, #tpu.memory_space<vmem>>, %arg3: memref<1x32xf32, #tpu.memory_space<vmem>>, %arg4: memref<1x32xf32, #tpu.memory_space<vmem>>, %arg5: memref<16x32xbf16, #tpu.memory_space<vmem>>) attributes {dimension_semantics = [#tpu.dimension_semantics<parallel>], iteration_bounds = array<i64: 2>, scalar_prefetch = 0 : i64, scratch_operands = 0 : i64, tpu.core_type = #tpu.core_type<tc>, window_params = [{transform_indices = @transform_0, window_bounds = array<i64: 16, 32>}, {pipeline_mode = #tpu.pipeline_mode<synchronous>, transform_indices = @transform_1, window_bounds = array<i64: 16, 32>}, {pipeline_mode = #tpu.pipeline_mode<synchronous>, transform_indices = @transform_2, window_bounds = array<i64: 1, 32>}, {pipeline_mode = #tpu.pipeline_mode<synchronous>, transform_indices = @transform_3, window_bounds = array<i64: 1, 32>}, {transform_indices = @transform_4, window_bounds = array<i64: 16, 32>}]} {
    %c0 = arith.constant 0 : index
    %c0_0 = arith.constant 0 : index
    %0 = vector.load %arg1[%c0, %c0_0] : memref<16x32xf32, #tpu.memory_space<vmem>>, vector<16x32xf32>
    %c0_1 = arith.constant 0 : index
    %c0_2 = arith.constant 0 : index
    %1 = vector.load %arg2[%c0_1, %c0_2] : memref<16x32xf32, #tpu.memory_space<vmem>>, vector<16x32xf32>
    %2 = arith.addf %0, %1 : vector<16x32xf32>
    %c0_3 = arith.constant 0 : index
    %c0_4 = arith.constant 0 : index
    %3 = vector.load %arg3[%c0_3, %c0_4] : memref<1x32xf32, #tpu.memory_space<vmem>>, vector<1x32xf32>
    %c0_5 = arith.constant 0 : index
    %c0_6 = arith.constant 0 : index
    %4 = vector.load %arg4[%c0_5, %c0_6] : memref<1x32xf32, #tpu.memory_space<vmem>>, vector<1x32xf32>
    %cst = arith.constant dense<0.000000e+00> : vector<16xf32>
    %5 = vector.multi_reduction <add>, %2, %cst [1] : vector<16x32xf32> to vector<16xf32>
    %6 = vector.shape_cast %5 : vector<16xf32> to vector<16x1xf32>
    %cst_7 = arith.constant 3.200000e+01 : f32
    %7 = vector.broadcast %cst_7 : f32 to vector<16x1xf32>
    %8 = arith.divf %6, %7 : vector<16x1xf32>
    %9 = vector.broadcast %8 : vector<16x1xf32> to vector<16x32xf32>
    %10 = arith.subf %2, %9 : vector<16x32xf32>
    %11 = arith.mulf %10, %10 : vector<16x32xf32>
    %cst_8 = arith.constant dense<0.000000e+00> : vector<16xf32>
    %12 = vector.multi_reduction <add>, %11, %cst_8 [1] : vector<16x32xf32> to vector<16xf32>
    %13 = vector.shape_cast %12 : vector<16xf32> to vector<16x1xf32>
    %cst_9 = arith.constant 3.200000e+01 : f32
    %14 = vector.broadcast %cst_9 : f32 to vector<16x1xf32>
    %15 = arith.divf %13, %14 : vector<16x1xf32>
    %16 = vector.broadcast %8 : vector<16x1xf32> to vector<16x32xf32>
    %17 = arith.subf %2, %16 : vector<16x32xf32>
    %cst_10 = arith.constant 9.99999997E-7 : f32
    %18 = vector.broadcast %cst_10 : f32 to vector<16x1xf32>
    %19 = arith.addf %15, %18 : vector<16x1xf32>
    %20 = math.rsqrt %19 : vector<16x1xf32>
    %21 = vector.broadcast %20 : vector<16x1xf32> to vector<16x32xf32>
    %22 = arith.mulf %17, %21 : vector<16x32xf32>
    %23 = vector.broadcast %3 : vector<1x32xf32> to vector<16x32xf32>
    %24 = arith.mulf %22, %23 : vector<16x32xf32>
    %25 = vector.broadcast %4 : vector<1x32xf32> to vector<16x32xf32>
    %26 = arith.addf %24, %25 : vector<16x32xf32>
    %27 = arith.truncf %26 : vector<16x32xf32> to vector<16x32xbf16>
    %c0_11 = arith.constant 0 : index
    %c0_12 = arith.constant 0 : index
    %28 = vector.load %arg5[%c0_11, %c0_12] : memref<16x32xbf16, #tpu.memory_space<vmem>>, vector<16x32xbf16>
    tpu.vector_store %arg5[%c0_11, %c0_12], %27 {strides = array<i32>} : memref<16x32xbf16, #tpu.memory_space<vmem>>, vector<16x32xbf16>,
    return
  }
  func.func @transform_0(%arg0: i32) -> (i32, i32) {
    %c0_i32 = arith.constant 0 : i32
    %c0_i32_0 = arith.constant 0 : i32
    return %arg0, %c0_i32 : i32, i32
  }
  func.func @transform_1(%arg0: i32) -> (i32, i32) {
    %c0_i32 = arith.constant 0 : i32
    %c0_i32_0 = arith.constant 0 : i32
    %c0_i32_1 = arith.constant 0 : i32
    return %c0_i32, %c0_i32_0 : i32, i32
  }
  func.func @transform_2(%arg0: i32) -> (i32, i32) {
    %c0_i32 = arith.constant 0 : i32
    %c0_i32_0 = arith.constant 0 : i32
    %c0_i32_1 = arith.constant 0 : i32
    return %c0_i32, %c0_i32_0 : i32, i32
  }
  func.func @transform_3(%arg0: i32) -> (i32, i32) {
    %c0_i32 = arith.constant 0 : i32
    %c0_i32_0 = arith.constant 0 : i32
    %c0_i32_1 = arith.constant 0 : i32
    return %c0_i32, %c0_i32_0 : i32, i32
  }
  func.func @transform_4(%arg0: i32) -> (i32, i32) {
    %c0_i32 = arith.constant 0 : i32
    %c0_i32_0 = arith.constant 0 : i32
    return %arg0, %c0_i32 : i32, i32
  }
}

</mosaic_0001>

<bundles_post_ra>
// kernel: tpu_custom_call.1
= control target key start
LH: loop header
LB: loop body
LE: loop exit
PB: predicated region body
PF: predicated region fallthrough
CT: control target
= control target key end

     0   :  { %9 = vsyncpa [#allocation3], 0  ;;  %s862_s0 = inlined_call_operand.hbm [shape: f32[32,32], index: 0, kind: input, shape index: {}]   ;;  %s863_s1 = inlined_call_operand.hbm [shape: f32[16,32], index: 1, kind: input, shape index: {}]   ;;  %s864_s2 = inlined_call_operand.vmem [shape: f32[1,32], index: 2, kind: input, shape index: {}]   ;;  %s865_s3 = inlined_call_operand.vmem [shape: f32[1,32], index: 3, kind: input, shape index: {}]   ;;  %s866_s4 = inlined_call_operand.hbm [shape: bf16[32,32], index: 4, kind: output, shape index: {}]  }
   0x1   :  { %11 = vsyncpa [#allocation3 + $0x1], 0 }
   0x2   :  { %12 = vsyncpa [#allocation6], 0 }
   0x3   :  { %13 = vsyncpa [#allocation4], 0 }
   0x4   :  { %15 = vsyncpa [#allocation4 + $0x1], 0  ;;  %s644_s15 = smov 0   ;;  %s646_s16 = smov 0  }
   0x5   :  { %s648_s17 = smov 0   ;;  %s650_s18 = smov 0  }
   0x6 LB: > { %s665_s19 = sadd.s32 4294967295, %s610_s18   ;;  %s393_s20 = sadd.s32 4294967294, %s610_s18   ;;  %s610_s18 = sphi %s650_s18, %s886_s18   ;;  %s606_s17 = sphi %s648_s17, %s885_s17   ;;  %s602_s16 = sphi %s646_s16, %s884_s16   ;;  %s598_s15 = sphi %s644_s15, %s883_s15  }
   0x7   : > { %p41_p0 = scmp.ne.s32.totalorder %s602_s16, %s598_s15  ;;  %p867_p1 = scmp.eq.s32.totalorder %s665_s19, 0 }
   0x8   : > { %p134_p3 = scmp.eq.s32.totalorder %s393_s20, 1  ;;  %p394_p5 = scmp.ge.s32.totalorder %s610_s18, 1 }
   0x9   : > { %p674_p4 = por %p867_p1, %p41_p0  ;;  %p141_p7 = scmp.lt.s32.totalorder %s610_s18, 3 }
   0xa   : > { %p679_p6 = por %p134_p3, %p41_p0  ;;  %s612_s24 = smov [#allocation5]  }
   0xb   : > { %s870_s21 = scalar_select %p674_p4, 1, 0 }
   0xc   : > { %s871_s22 = scalar_select %p679_p6, 1, 0 }
   0xd   : > { %p684_p8 = pnand %p394_p5, %p141_p7  ;;  %s153_s25 = sshll.u32 %s612_s24, 4  ;;  %s688_s25 = int_to_ptr.vmem [resolvable:$true] %s153_s25 }
   0xe   : > { %s700_s27 = sadd.s32 1, %s610_s18   ;;  %s28_s28 = sadd.s32 1, %s606_s17 }
   0xf   : > { %s872_s23 = scalar_select %p684_p8, 1, 0 }
  0x10   : > { %p425_p9 = pneg %p684_p8  ;;  %s25_s29 = ssub.s32 %s610_s18, %s700_s27 }
  0x11   : > { %s482_s6 = scalar_lea.hbm %s863_s1, 256 }
  0x12   : > { %p695_p11 = pnand %p425_p9, %p867_p1  ;;  %p483_p12 = scmp.ne.s32.totalorder %s863_s1, %s482_s6 }
  0x13   : > { %p489_p5 = scmp.lt.u32.totalorder %s482_s6, %s863_s1 }
  0x14   : > { %p484_p13 = pneg %p695_p11 }
  0x16   : > { %p485_p0 = pnand %p484_p13, %p483_p12 }
  0x18   : > { %p486_p3 = pneg %p485_p0 }
  0x1a   : > { %p491_p7 = pnand %p489_p5, %p486_p3 }
  0x1c   : > { %494 = shalt.err (!%p491_p7)
}
  0x1d   : > { %s495_s11 = scalar_lea.vmem %s688_s25, 256  ;;  %p503_p2 = scmp.lt.s32.totalorder %s688_s25, %s688_s25 }
  0x1e   : > { %p496_p9 = scmp.ne.s32.totalorder %s688_s25, %s495_s11  ;;  %p504_p6 = scmp.lt.s32.totalorder %s495_s11, %s495_s11 }
  0x20   : > { %p498_p10 = pnand %p496_p9, %p484_p13  ;;  %p505_p4 = por %p504_p6, %p503_p2 }
  0x22   : > { %p499_p1 = pneg %p498_p10 }
  0x24   : > { %p506_p8 = pnand %p505_p4, %p499_p1 }
  0x26   : > { %509 = shalt.err (!%p506_p8)
}
  0x27   : > { %s613_s12 = smov 128   ;;  %s614_s13 = smov 8  }
  0x28   : > { %428 = dma.hbm_to_vmem [thread:$0]  (!%p695_p11), %s863_s1, 256, %s688_s25, [#allocation6], %s613_s12, %s613_s12, %s614_s13  }
  0x29   : > { %p26_p1 = scmp.eq.s32.totalorder %s25_s29, 0  ;;  %p35_p2 = scmp.ne.s32.totalorder %s606_s17, %s602_s16 }
  0x2a   : > { %p36_p4 = scmp.eq.s32.totalorder %s610_s18, 0  ;;  %p438_p6 = scmp.lt.s32.totalorder %s610_s18, 2 }
  0x2b   : > { %s734_s24 = scalar_select %p26_p1, %s606_s17, %s28_s28  }
  0x2c   : > { %p37_p8 = por %p36_p4, %p35_p2  ;;  %p874_p10 = scmp.eq.s32.totalorder %s665_s19, 1 }
  0x2d   : > { %s173_s26 = sand.u32 1, %s606_s17   ;;  %s413_s5 = sshll.u32 %s610_s18, 8 }
  0x2e   : > { %p738_p12 = por %p874_p10, %p35_p2  ;;  %s397_s6 = sshll.u32 %s173_s26, 4 }
  0x2f   : > { %s747_s9 = scalar_lea.hbm %s862_s0, %s413_s5  ;;  %s177_s25 = scalar_lea.vmem [#allocation2], %s397_s6 }
  0x30   : > { %s184_s28 = sshll.u32 %s177_s25, 4  ;;  %p749_p11 = pnand %p438_p6, %p37_p8  ;;  %s753_s28 = int_to_ptr.vmem [resolvable:$true] %s184_s28 }
  0x31   : > { %s755_s10 = scalar_lea.sflag [#allocation3], %s173_s26  ;;  %s510_s11 = scalar_lea.hbm %s747_s9, 256 }
  0x32   : > { %p511_p13 = scmp.ne.s32.totalorder %s747_s9, %s510_s11  ;;  %p512_p0 = pneg %p749_p11 }
  0x33   : > { %s515_s5 = scalar_lea.hbm %s862_s0, 512  ;;  %p516_p7 = scmp.lt.u32.totalorder %s747_s9, %s862_s0 }
  0x34   : > { %p513_p3 = pnand %p512_p0, %p511_p13  ;;  %p517_p9 = scmp.lt.u32.totalorder %s515_s5, %s510_s11 }
  0x35   : > { %p519_p2 = scmp.lt.u32.totalorder %s510_s11, %s747_s9 }
  0x36   : > { %p514_p5 = pneg %p513_p3  ;;  %p518_p1 = por %p517_p9, %p516_p7 }
  0x38   : > { %p520_p4 = por %p519_p2, %p518_p1 }
  0x3a   : > { %p521_p6 = pnand %p520_p4, %p514_p5 }
  0x3c   : > { %524 = shalt.err (!%p521_p6)
}
  0x3d   : > { %s525_s26 = scalar_lea.vmem %s753_s28, 256  ;;  %s615_s8 = smov [#allocation2]  }
  0x3e   : > { %p526_p8 = scmp.ne.s32.totalorder %s753_s28, %s525_s26  ;;  %s530_s25 = sshll.u32 %s615_s8, 4  ;;  %s531_s25 = int_to_ptr.vmem [resolvable:$false] %s530_s25 }
  0x3f   : > { %s532_s14 = scalar_lea.vmem %s531_s25, 512  ;;  %p533_p3 = scmp.lt.s32.totalorder %s753_s28, %s531_s25 }
  0x40   : > { %p528_p10 = pnand %p526_p8, %p512_p0  ;;  %p534_p7 = scmp.lt.s32.totalorder %s532_s14, %s525_s26 }
  0x42   : > { %p529_p13 = pneg %p528_p10  ;;  %p535_p9 = por %p534_p7, %p533_p3 }
  0x44   : > { %p536_p1 = pnand %p535_p9, %p529_p13 }
  0x46   : > { %539 = shalt.err (!%p536_p1)
}
  0x47   : > { %432 = dma.hbm_to_vmem [thread:$0]  (!%p749_p11), %s747_s9, 256, %s753_s28, %s755_s10, %s613_s12, %s613_s12, %s614_s13  }
  0x48   : > { %p877_p0 = scmp.ne.s32.totalorder %s872_s23, 0 }
  0x49   : > { %s789_s11 = sand.u32 (!%p877_p0), 1, %s602_s16   ;;  %p878_p5 = scmp.ne.s32.totalorder (!%p877_p0), %s870_s21, 0 }
  0x4a   : > { %196 = sbr.rel (%p877_p0) target bundleno = 423 (0x1a7), region = 36  ;;  %s401_s20 = sshll.u32 (!%p877_p0), %s789_s11, 4 }
  0x4b   : > { %s199_s5 = scalar_lea.sflag (!%p877_p0), [#allocation3], %s789_s11  ;;  %s202_s6 = scalar_lea.vmem (!%p877_p0), [#allocation2], %s401_s20 }
  0x51   : > { %585 = dma.done.wait (%p878_p5), %s199_s5, 256  }
  0x52   : > { %587 = vsyncadd (%p878_p5), %s199_s5, 4294967040  ;;  %p879_p2 = scmp.eq.s32.totalorder %s665_s19, 0 }
  0x54   : > { %589 = dma.done.wait (%p879_p2), [#allocation6], 256   ;;  %p880_p11 = pmov %p879_p2 }
  0x55   : > { %v233_v0 = vld [vmem:[%s202_s6] sm:$0xff]  ;;  %vm241_vm0 = vcmask 261120   ;;  %v234_v2 = vld [vmem:[%s202_s6 + $0x8] sm:$0xff]  ;;  %s403_s9 = sshll.u32 %s789_s11, 3  ;;  %vm293_vm1 = vcmask 257024   ;;  %s416_s28 = sshll.u32 %s665_s19, 7 }
  0x56   : > { %591 = vsyncadd (%p880_p11), [#allocation6], 4294967040  ;;  %v235_v1 = vld [vmem:[#allocation5] sm:$0xff]  ;;  %v236_v4 = vld [vmem:[#allocation5 + $0x8] sm:$0xff]  ;;  %s230_s29 = scalar_lea.vmem [#allocation7], %s403_s9  ;;  %s816_s8 = scalar_lea.hbm %s866_s4, %s416_s28 }
  0x57   : > { %v237_v3 = vadd.f32 %v235_v1, %v233_v0  ;;  %v238_v5 = vadd.f32 %v236_v4, %v234_v2  ;;  %v404_v25 = vld [vmem:[%s864_s2] ss:$0 sm:$0xff]  ;;  %s310_s10 = sshll.u32 %s230_s29, 4  ;;  %s297_s25 = scalar_lea.sflag [#allocation4], %s789_s11  ;;  %s818_s10 = int_to_ptr.vmem [resolvable:$true] %s310_s10 }
  0x58   : > { %v405_v27 = vld [vmem:[%s865_s3] ss:$0 sm:$0xff]  ;;  %s540_s14 = scalar_lea.vmem %s818_s10, 128  ;;  %s616_s19 = smov [#allocation7]  }
  0x59   : > { %v242_v6 = vsel %vm241_vm0, %v237_v3, 0.0  ;;  %v245_v7 = vsel %vm241_vm0, %v238_v5, 0.0  ;;  %p541_p4 = scmp.ne.s32.totalorder %s818_s10, %s540_s14  ;;  %s544_s20 = sshll.u32 %s616_s19, 4  ;;  %s545_s20 = int_to_ptr.vmem [resolvable:$false] %s544_s20 }
  0x5a   : > { %243 = vadd.xlane.f32.xlu0 %v242_v6  ;;  %s546_s5 = scalar_lea.vmem %s545_s20, 256  ;;  %p547_p10 = scmp.lt.s32.totalorder %s818_s10, %s545_s20 }
  0x5b   : > { %p542_p6 = pnand %p541_p4, %p738_p12  ;;  %p548_p13 = scmp.lt.s32.totalorder %s546_s5, %s540_s14 }
  0x5d   : > { %p543_p8 = pneg %p542_p6  ;;  %p549_p3 = por %p548_p13, %p547_p10 }
  0x5e   : > { %246 = vadd.xlane.f32.xlu0 %v245_v7 }
  0x5f   : > { %p550_p7 = pnand %p549_p3, %p543_p8 }
  0xe7   : > { %v244_v8 = vpop.xlane.xlu0 %243 }
  0xe8   : > { %v249_v9 = vmul.f32 0.03125, %v244_v8 }
  0xea   : > { %v251_v10 = vsub.f32 %v237_v3, %v249_v9 }
  0xeb   : > { %v247_v11 = vpop.xlane.xlu0 %246 }
  0xec   : > { %v250_v12 = vmul.f32 0.03125, %v247_v11  ;;  %v253_v13 = vmul.f32 %v251_v10, %v251_v10 }
  0xee   : > { %v252_v14 = vsub.f32 %v238_v5, %v250_v12  ;;  %v255_v15 = vsel %vm241_vm0, %v253_v13, 0.0 }
  0xef   : > { %256 = vadd.xlane.f32.xlu1 %v255_v15 }
  0xf0   : > { %v254_v16 = vmul.f32 %v252_v14, %v252_v14 }
  0xf2   : > { %v258_v17 = vsel %vm241_vm0, %v254_v16, 0.0 }
  0xf3   : > { %259 = vadd.xlane.f32.xlu1 %v258_v17 }
 0x17c   : > { %v257_v18 = vpop.xlane.xlu1 %256 }
 0x17d   : > { %v261_v19 = vmul.f32 0.03125, %v257_v18 }
 0x17f   : > { %v263_v20 = vadd.f32 1e-06, %v261_v19 }
 0x180   : > { %v260_v21 = vpop.xlane.xlu1 %259 }
 0x181   : > { %478 = vrsqrt.f32 %v263_v20  ;;  %v262_v22 = vmul.f32 0.03125, %v260_v21 }
 0x183   : > { %v264_v23 = vadd.f32 1e-06, %v262_v22 }
 0x185   : > { %480 = vrsqrt.f32 %v264_v23 }
 0x18b   : > { %v479_v24 = vpop.eup %478 }
 0x18c   : > { %v267_v26 = vmul.f32 %v479_v24, %v251_v10 }
 0x18e   : > { %v275_v28 = vmul.f32 %v404_v25, %v267_v26 }
 0x18f   : > { %v481_v29 = vpop.eup %480 }
 0x190   : > { %v283_v30 = vadd.f32 %v405_v27, %v275_v28  ;;  %v268_v31 = vmul.f32 %v481_v29, %v252_v14 }
 0x192   : > { %v414_v32 = vpack.c.bf16 %v283_v30, %v283_v30  ;;  %v276_v33 = vmul.f32 %v404_v25, %v268_v31 }
 0x194   : > { %v284_v34 = vadd.f32 %v405_v27, %v276_v33  ;;  %294 = vst.msk [vmem:[%s230_s29] sm:$0xf] %vm293_vm1, %v414_v32 }
 0x196   : > { %v415_v35 = vpack.c.bf16 %v284_v34, %v284_v34 }
 0x198   : > { %295 = vst.msk [vmem:[%s230_s29 + $0x4] sm:$0xf] %vm293_vm1, %v415_v35 }
 0x199   : > { %553 = shalt.err (!%p550_p7)
}
 0x19a   : > { %s554_s6 = scalar_lea.hbm %s816_s8, 128  ;;  %s558_s12 = scalar_lea.hbm %s866_s4, 256 }
 0x19b   : > { %p555_p9 = scmp.ne.s32.totalorder %s816_s8, %s554_s6  ;;  %p559_p5 = scmp.lt.u32.totalorder %s816_s8, %s866_s4 }
 0x19c   : > { %p560_p2 = scmp.lt.u32.totalorder %s558_s12, %s554_s6  ;;  %p562_p4 = scmp.lt.u32.totalorder %s554_s6, %s816_s8 }
 0x19d   : > { %p556_p1 = pnand %p555_p9, %p738_p12 }
 0x19e   : > { %p561_p11 = por %p560_p2, %p559_p5 }
 0x19f   : > { %p557_p0 = pneg %p556_p1 }
 0x1a0   : > { %p563_p6 = por %p562_p4, %p561_p11 }
 0x1a2   : > { %p564_p8 = pnand %p563_p6, %p557_p0 }
 0x1a4   : > { %567 = shalt.err (!%p564_p8)
}
 0x1a5   : > { %s617_s28 = smov 64   ;;  %s618_s29 = smov 4  }
 0x1a6   : > { %423 = dma.vmem_to_hbm [thread:$0]  (%p738_p12), %s818_s10, 128, %s816_s8, %s297_s25, %s617_s28, %s617_s28, %s618_s29  }
 0x1a7 PF: > { %s325_s7 = sand.u32 1, %s598_s15   ;;  %p881_p10 = scmp.ne.s32.totalorder %s871_s22, 0 }
 0x1a8   : > { %p882_p13 = scmp.ge.s32.totalorder %s610_s18, 2  ;;  %s326_s26 = scalar_lea.sflag [#allocation4], %s325_s7 }
 0x1aa   : > { %p434_p3 = pnand %p882_p13, %p881_p10 }
 0x1ac   : > { %593 = dma.done.wait (!%p434_p3), %s326_s26, 128  }
 0x1ad   : > { %595 = vsyncadd (!%p434_p3), %s326_s26, 4294967168  ;;  %p18_p7 = scmp.ge.s32.totalorder %s700_s27, 4   ;;  %s883_s15 = smov %s602_s16 }
 0x1ae   : > { %s884_s16 = smov %s606_s17  ;;  %s885_s17 = smov %s734_s24 }
 0x1af   : > { %s886_s18 = smov %s700_s27  ;;  %20 = sbr.rel (!%p18_p7) target bundleno = 6 (0x6), region = 85 }
 0x1b6   :  { %331 = vsyncpa [#allocation3], 1 }
 0x1b7   :  { %333 = vsyncpa [#allocation3 + $0x1], 1 }
 0x1b8   :  { %334 = vsyncpa [#allocation6], 1 }
 0x1b9   :  { %335 = vsyncpa [#allocation4], 1 }
 0x1ba   :  { %337 = vsyncpa [#allocation4 + $0x1], 1 }

</bundles_post_ra>
